<compile_context>
chip_gen: v5e
topology: v5e:2x2
jax: 0.10.0
libtpu: 0.0.40
codegen_flags: <defaults>
</compile_context>

<pallas_src>
import functools

import jax
import jax.numpy as jnp
from jax.experimental import pallas as pl
from jax.experimental.pallas import tpu as pltpu

_LANE = 128
_SUBLANE = 8
_NEG_BIG = -1e30  # finite large-negative pad bias -> exp() of pad logits is exactly 0


def _round_up(n, m):
    return ((n + m - 1) // m) * m


def _masked_net_kernel(x_ref, w_in_ref, b_in_ref, w_h_ref, b_h_ref,
                       w_out_ref, b_out_ref, o_ref, *, num_layers):
    """Fused MLP forward for one batch tile: input layer -> L hidden layers -> heads -> softmax."""
    # x arrives as raw f32 straight from HBM (no wrapper pad/cast pass); cast to
    # bf16 here — the VPU cast is free filler under the input DMA / MXU work.
    x = x_ref[...].astype(jnp.bfloat16)

    # Input layer: (tile_b, 784)[bf16] @ (784, H)[bf16] -> f32 accumulate, + bias, ReLU.
    h = jnp.dot(x, w_in_ref[...], preferred_element_type=jnp.float32)
    h = jnp.maximum(h + b_in_ref[...], 0.0)

    # Hidden layers (static unroll — num_layers is small and known at trace time).
    # TODO(synk): switch to lax.fori_loop with dynamic w_h_ref indexing if num_layers grows large.
    for i in range(num_layers):
        h = jnp.dot(h.astype(jnp.bfloat16), w_h_ref[i],
                    preferred_element_type=jnp.float32)
        h = jnp.maximum(h + b_h_ref[i], 0.0)

    # All task heads fused as one (H, T_pad) matmul; pad columns carry zero weights
    # and -1e30 bias so their exp() is exactly 0 and the softmax is unchanged.
    logits = jnp.dot(h.astype(jnp.bfloat16), w_out_ref[...],
                     preferred_element_type=jnp.float32) + b_out_ref[...]

    # Numerically stable softmax over the (padded, lane-dense) task dimension.
    m = jnp.max(logits, axis=-1, keepdims=True)
    e = jnp.exp(logits - m)
    inv = pl.reciprocal(jnp.sum(e, axis=-1, keepdims=True), approx=False)
    o_ref[...] = (e * inv).astype(o_ref.dtype)


def masked_net_forward(x_nchw, params, *, num_layers, tile_b=512):
    """x_nchw: (B, 1, 28, 28) float32  ->  (B, num_tasks) float32 softmax probs."""
    B = x_nchw.shape[0]
    x_flat = x_nchw.reshape(B, -1).astype(jnp.float32)   # torch.flatten(inp, start_dim=1)
    F = x_flat.shape[1]                                   # 784: full-dim block, no K padding
    H = params["w_in"].shape[1]
    T = params["w_out"].shape[1]
    T_pad = _round_up(T, _LANE)                           # lane-dense head/output dim

    # Batch tile: as big as tile_b, but capped so the grid has >= 2 steps when the
    # batch allows it (megacore sharding on v7x needs >= 2 grid steps).
    tile = min(tile_b, _round_up(max((B + 1) // 2, 1), _SUBLANE))
    B_pad = _round_up(B, tile)
    if B_pad != B:
        # Batch-only zero pad; no feature-dim padding and no wrapper-side bf16 cast.
        x_flat = jnp.pad(x_flat, ((0, B_pad - B), (0, 0)))

    # Weights: bf16 matmul operands (tiny, one-time cast); biases stay f32.
    w_in = params["w_in"].astype(jnp.bfloat16)
    b_in = params["b_in"].astype(jnp.float32)
    w_h = params["w_h"].astype(jnp.bfloat16)
    b_h = params["b_h"].astype(jnp.float32)
    w_out = jnp.zeros((H, T_pad), jnp.bfloat16).at[:, :T].set(
        params["w_out"].astype(jnp.bfloat16))
    b_out = jnp.full((1, T_pad), _NEG_BIG, jnp.float32).at[:, :T].set(
        params["b_out"].astype(jnp.float32))

    kernel = functools.partial(_masked_net_kernel, num_layers=num_layers)

    def const_spec(*shape):
        # Whole array as one block, same block every grid step -> DMA'd once,
        # VMEM-resident for the whole grid.
        return pl.BlockSpec(shape, lambda b: (0,) * len(shape))

    # Advisory cost estimate so XLA schedules surrounding ops around the custom call.
    flops = 2 * B_pad * (F * H + num_layers * H * H + H * T_pad)
    bytes_accessed = (B_pad * F * 4                       # x (f32 in)
                      + F * H * 2 + H * 4                 # input layer weights/bias
                      + num_layers * (H * H * 2 + H * 4)  # hidden layers
                      + H * T_pad * 2 + T_pad * 4         # heads
                      + B_pad * T_pad * 2)                # out (bf16)
    cost = pl.CostEstimate(flops=flops,
                           transcendentals=B_pad * (T_pad + 1),
                           bytes_accessed=bytes_accessed)

    out = pl.pallas_call(
        kernel,
        out_shape=jax.ShapeDtypeStruct((B_pad, T_pad), jnp.bfloat16),
        grid=(B_pad // tile,),
        in_specs=[
            pl.BlockSpec((tile, F), lambda b: (b, 0)),     # x: raw f32, tiled over batch
            const_spec(F, H),                              # w_in
            const_spec(1, H),                              # b_in
            const_spec(num_layers, H, H),                  # w_h
            const_spec(num_layers, 1, H),                  # b_h
            const_spec(H, T_pad),                          # w_out (lane-padded heads)
            const_spec(1, T_pad),                          # b_out (-1e30 on pad cols)
        ],
        out_specs=pl.BlockSpec((tile, T_pad), lambda b: (b, 0)),
        compiler_params=pltpu.CompilerParams(
            dimension_semantics=("parallel",),             # megacore sharding on v7x
        ),
        cost_estimate=cost,
    )(x_flat, w_in, b_in, w_h, b_h, w_out, b_out)

    return out[:B, :T].astype(jnp.float32)


def init_params(key, *, in_features, num_hidden, num_layers, num_tasks):
    """Deterministic parameter init (stands in for BayesianLinear's weight_mu / bias_mu)."""
    ks = jax.random.split(key, 6)
    scale_in = 1.0 / jnp.sqrt(in_features)
    scale_h = 1.0 / jnp.sqrt(num_hidden)
    return {
        # stored as (in, out) so the kernel computes x @ W
        "w_in": jax.random.normal(ks[0], (in_features, num_hidden), jnp.float32) * scale_in,
        "b_in": jax.random.normal(ks[1], (1, num_hidden), jnp.float32) * 0.01,
        "w_h": jax.random.normal(ks[2], (num_layers, num_hidden, num_hidden), jnp.float32) * scale_h,
        "b_h": jax.random.normal(ks[3], (num_layers, 1, num_hidden), jnp.float32) * 0.01,
        # per-task heads (H -> 1) concatenated into (H, T)
        "w_out": jax.random.normal(ks[4], (num_hidden, num_tasks), jnp.float32) * scale_h,
        "b_out": jax.random.normal(ks[5], (1, num_tasks), jnp.float32) * 0.01,
    }


def _reference_forward(x_nchw, params, *, num_layers):
    """Plain-JAX f32 reference mirroring the PyTorch forward (sample=False)."""
    h = x_nchw.reshape(x_nchw.shape[0], -1)
    h = jnp.maximum(h @ params["w_in"] + params["b_in"], 0.0)
    for i in range(num_layers):
        h = jnp.maximum(h @ params["w_h"][i] + params["b_h"][i], 0.0)
    logits = h @ params["w_out"] + params["b_out"]
    return jax.nn.softmax(logits, axis=-1)


if __name__ == "__main__":
    # Small, module-consistent config: 28x28 inputs (fixed by the module), modest hidden size.
    B, C, HW = 2, 1, 28
    num_hidden = 128
    num_layers = 2
    num_tasks = 3          # model.add_task(t) called 3 times -> 3 output heads

    key = jax.random.PRNGKey(0)
    k_x, k_p = jax.random.split(key)
    x = jax.random.normal(k_x, (B, C, HW, HW), jnp.float32)
    params = init_params(k_p, in_features=C * HW * HW, num_hidden=num_hidden,
                         num_layers=num_layers, num_tasks=num_tasks)

    out = masked_net_forward(x, params, num_layers=num_layers)
    out = jax.block_until_ready(out)

    ref = _reference_forward(x, params, num_layers=num_layers)
    assert out.shape == (B, num_tasks), f"bad output shape {out.shape}"
    # bf16 matmul operands / bf16 output store vs an all-f32 reference: loose tolerance.
    assert jnp.allclose(out, ref, atol=2e-2, rtol=2e-2), "Pallas output mismatch vs reference"
    assert jnp.allclose(jnp.sum(out, axis=-1), 1.0, atol=1e-2), "softmax rows must sum to ~1"

    print("KERNEL_OK")
</pallas_src>

<mosaic_0001>
module attributes {stable_mosaic.version = 11 : i64} {
  func.func @_masked_net_kernel(%arg0: i32, %arg1: memref<8x784xf32, #tpu.memory_space<vmem>>, %arg2: memref<784x128xbf16, #tpu.memory_space<vmem>>, %arg3: memref<1x128xf32, #tpu.memory_space<vmem>>, %arg4: memref<2x128x128xbf16, #tpu.memory_space<vmem>>, %arg5: memref<2x1x128xf32, #tpu.memory_space<vmem>>, %arg6: memref<128x128xbf16, #tpu.memory_space<vmem>>, %arg7: memref<1x128xf32, #tpu.memory_space<vmem>>, %arg8: memref<8x128xbf16, #tpu.memory_space<vmem>>) attributes {dimension_semantics = [#tpu.dimension_semantics<parallel>], iteration_bounds = array<i64: 1>, scalar_prefetch = 0 : i64, scratch_operands = 0 : i64, tpu.core_type = #tpu.core_type<tc>, window_params = [{transform_indices = @transform_0, window_bounds = array<i64: 8, 784>}, {pipeline_mode = #tpu.pipeline_mode<synchronous>, transform_indices = @transform_1, window_bounds = array<i64: 784, 128>}, {pipeline_mode = #tpu.pipeline_mode<synchronous>, transform_indices = @transform_2, window_bounds = array<i64: 1, 128>}, {pipeline_mode = #tpu.pipeline_mode<synchronous>, transform_indices = @transform_3, window_bounds = array<i64: 2, 128, 128>}, {pipeline_mode = #tpu.pipeline_mode<synchronous>, transform_indices = @transform_4, window_bounds = array<i64: 2, 1, 128>}, {pipeline_mode = #tpu.pipeline_mode<synchronous>, transform_indices = @transform_5, window_bounds = array<i64: 128, 128>}, {pipeline_mode = #tpu.pipeline_mode<synchronous>, transform_indices = @transform_6, window_bounds = array<i64: 1, 128>}, {transform_indices = @transform_7, window_bounds = array<i64: 8, 128>}]} {
    %c0 = arith.constant 0 : index
    %c0_0 = arith.constant 0 : index
    %0 = vector.load %arg1[%c0, %c0_0] : memref<8x784xf32, #tpu.memory_space<vmem>>, vector<8x784xf32>
    %1 = arith.truncf %0 : vector<8x784xf32> to vector<8x784xbf16>
    %c0_1 = arith.constant 0 : index
    %c0_2 = arith.constant 0 : index
    %2 = vector.load %arg2[%c0_1, %c0_2] : memref<784x128xbf16, #tpu.memory_space<vmem>>, vector<784x128xbf16>
    %cst = arith.constant dense<0.000000e+00> : vector<8x128xf32>
    %3 = tpu.matmul %1, %2, %cst {dimension_numbers = #tpu.dot_dimension_numbers<[1], [0], [0], [1], [0, 0, 1, 1], [], []>} : vector<8x784xbf16>, vector<784x128xbf16>, vector<8x128xf32> -> vector<8x128xf32>
    %c0_3 = arith.constant 0 : index
    %c0_4 = arith.constant 0 : index
    %4 = vector.load %arg3[%c0_3, %c0_4] : memref<1x128xf32, #tpu.memory_space<vmem>>, vector<1x128xf32>
    %5 = vector.broadcast %4 : vector<1x128xf32> to vector<8x128xf32>
    %6 = arith.addf %3, %5 : vector<8x128xf32>
    %cst_5 = arith.constant 0.000000e+00 : f32
    %7 = vector.broadcast %cst_5 : f32 to vector<8x128xf32>
    %8 = arith.maximumf %6, %7 : vector<8x128xf32>
    %9 = arith.truncf %8 : vector<8x128xf32> to vector<8x128xbf16>
    %c0_6 = arith.constant 0 : index
    %c0_7 = arith.constant 0 : index
    %c0_8 = arith.constant 0 : index
    %10 = vector.load %arg4[%c0_6, %c0_7, %c0_8] : memref<2x128x128xbf16, #tpu.memory_space<vmem>>, vector<1x128x128xbf16>
    %11 = vector.shape_cast %10 : vector<1x128x128xbf16> to vector<128x128xbf16>
    %cst_9 = arith.constant dense<0.000000e+00> : vector<8x128xf32>
    %12 = tpu.matmul %9, %11, %cst_9 {dimension_numbers = #tpu.dot_dimension_numbers<[1], [0], [0], [1], [0, 0, 1, 1], [], []>} : vector<8x128xbf16>, vector<128x128xbf16>, vector<8x128xf32> -> vector<8x128xf32>
    %c0_10 = arith.constant 0 : index
    %c0_11 = arith.constant 0 : index
    %c0_12 = arith.constant 0 : index
    %13 = vector.load %arg5[%c0_10, %c0_11, %c0_12] : memref<2x1x128xf32, #tpu.memory_space<vmem>>, vector<1x1x128xf32>
    %14 = vector.shape_cast %13 : vector<1x1x128xf32> to vector<1x128xf32>
    %15 = vector.broadcast %14 : vector<1x128xf32> to vector<8x128xf32>
    %16 = arith.addf %12, %15 : vector<8x128xf32>
    %cst_13 = arith.constant 0.000000e+00 : f32
    %17 = vector.broadcast %cst_13 : f32 to vector<8x128xf32>
    %18 = arith.maximumf %16, %17 : vector<8x128xf32>
    %19 = arith.truncf %18 : vector<8x128xf32> to vector<8x128xbf16>
    %c1 = arith.constant 1 : index
    %c0_14 = arith.constant 0 : index
    %c0_15 = arith.constant 0 : index
    %20 = vector.load %arg4[%c1, %c0_14, %c0_15] : memref<2x128x128xbf16, #tpu.memory_space<vmem>>, vector<1x128x128xbf16>
    %21 = vector.shape_cast %20 : vector<1x128x128xbf16> to vector<128x128xbf16>
    %cst_16 = arith.constant dense<0.000000e+00> : vector<8x128xf32>
    %22 = tpu.matmul %19, %21, %cst_16 {dimension_numbers = #tpu.dot_dimension_numbers<[1], [0], [0], [1], [0, 0, 1, 1], [], []>} : vector<8x128xbf16>, vector<128x128xbf16>, vector<8x128xf32> -> vector<8x128xf32>
    %c1_17 = arith.constant 1 : index
    %c0_18 = arith.constant 0 : index
    %c0_19 = arith.constant 0 : index
    %23 = vector.load %arg5[%c1_17, %c0_18, %c0_19] : memref<2x1x128xf32, #tpu.memory_space<vmem>>, vector<1x1x128xf32>
    %24 = vector.shape_cast %23 : vector<1x1x128xf32> to vector<1x128xf32>
    %25 = vector.broadcast %24 : vector<1x128xf32> to vector<8x128xf32>
    %26 = arith.addf %22, %25 : vector<8x128xf32>
    %cst_20 = arith.constant 0.000000e+00 : f32
    %27 = vector.broadcast %cst_20 : f32 to vector<8x128xf32>
    %28 = arith.maximumf %26, %27 : vector<8x128xf32>
    %29 = arith.truncf %28 : vector<8x128xf32> to vector<8x128xbf16>
    %c0_21 = arith.constant 0 : index
    %c0_22 = arith.constant 0 : index
    %30 = vector.load %arg6[%c0_21, %c0_22] : memref<128x128xbf16, #tpu.memory_space<vmem>>, vector<128x128xbf16>
    %cst_23 = arith.constant dense<0.000000e+00> : vector<8x128xf32>
    %31 = tpu.matmul %29, %30, %cst_23 {dimension_numbers = #tpu.dot_dimension_numbers<[1], [0], [0], [1], [0, 0, 1, 1], [], []>} : vector<8x128xbf16>, vector<128x128xbf16>, vector<8x128xf32> -> vector<8x128xf32>
    %c0_24 = arith.constant 0 : index
    %c0_25 = arith.constant 0 : index
    %32 = vector.load %arg7[%c0_24, %c0_25] : memref<1x128xf32, #tpu.memory_space<vmem>>, vector<1x128xf32>
    %33 = vector.broadcast %32 : vector<1x128xf32> to vector<8x128xf32>
    %34 = arith.addf %31, %33 : vector<8x128xf32>
    %cst_26 = arith.constant dense<0xFF800000> : vector<8xf32>
    %35 = vector.multi_reduction <maximumf>, %34, %cst_26 [1] : vector<8x128xf32> to vector<8xf32>
    %36 = vector.shape_cast %35 : vector<8xf32> to vector<8x1xf32>
    %37 = vector.broadcast %36 : vector<8x1xf32> to vector<8x128xf32>
    %38 = arith.subf %34, %37 : vector<8x128xf32>
    %39 = math.exp %38 : vector<8x128xf32>
    %cst_27 = arith.constant dense<0.000000e+00> : vector<8xf32>
    %40 = vector.multi_reduction <add>, %39, %cst_27 [1] : vector<8x128xf32> to vector<8xf32>
    %41 = vector.shape_cast %40 : vector<8xf32> to vector<8x1xf32>
    %42 = tpu.reciprocal %41 : vector<8x1xf32> -> vector<8x1xf32>
    %43 = vector.broadcast %42 : vector<8x1xf32> to vector<8x128xf32>
    %44 = arith.mulf %39, %43 : vector<8x128xf32>
    %45 = arith.truncf %44 : vector<8x128xf32> to vector<8x128xbf16>
    %c0_28 = arith.constant 0 : index
    %c0_29 = arith.constant 0 : index
    %46 = vector.load %arg8[%c0_28, %c0_29] : memref<8x128xbf16, #tpu.memory_space<vmem>>, vector<8x128xbf16>
    tpu.vector_store %arg8[%c0_28, %c0_29], %45 {strides = array<i32>} : memref<8x128xbf16, #tpu.memory_space<vmem>>, vector<8x128xbf16>,
    return
  }
  func.func @transform_0(%arg0: i32) -> (i32, i32) {
    %c0_i32 = arith.constant 0 : i32
    %c0_i32_0 = arith.constant 0 : i32
    return %arg0, %c0_i32 : i32, i32
  }
  func.func @transform_1(%arg0: i32) -> (i32, i32) {
    %c0_i32 = arith.constant 0 : i32
    %c0_i32_0 = arith.constant 0 : i32
    %c0_i32_1 = arith.constant 0 : i32
    return %c0_i32, %c0_i32_0 : i32, i32
  }
  func.func @transform_2(%arg0: i32) -> (i32, i32) {
    %c0_i32 = arith.constant 0 : i32
    %c0_i32_0 = arith.constant 0 : i32
    %c0_i32_1 = arith.constant 0 : i32
    return %c0_i32, %c0_i32_0 : i32, i32
  }
  func.func @transform_3(%arg0: i32) -> (i32, i32, i32) {
    %c0_i32 = arith.constant 0 : i32
    %c0_i32_0 = arith.constant 0 : i32
    %c0_i32_1 = arith.constant 0 : i32
    %c0_i32_2 = arith.constant 0 : i32
    return %c0_i32, %c0_i32_0, %c0_i32_1 : i32, i32, i32
  }
  func.func @transform_4(%arg0: i32) -> (i32, i32, i32) {
    %c0_i32 = arith.constant 0 : i32
    %c0_i32_0 = arith.constant 0 : i32
    %c0_i32_1 = arith.constant 0 : i32
    %c0_i32_2 = arith.constant 0 : i32
    return %c0_i32, %c0_i32_0, %c0_i32_1 : i32, i32, i32
  }
  func.func @transform_5(%arg0: i32) -> (i32, i32) {
    %c0_i32 = arith.constant 0 : i32
    %c0_i32_0 = arith.constant 0 : i32
    %c0_i32_1 = arith.constant 0 : i32
    return %c0_i32, %c0_i32_0 : i32, i32
  }
  func.func @transform_6(%arg0: i32) -> (i32, i32) {
    %c0_i32 = arith.constant 0 : i32
    %c0_i32_0 = arith.constant 0 : i32
    %c0_i32_1 = arith.constant 0 : i32
    return %c0_i32, %c0_i32_0 : i32, i32
  }
  func.func @transform_7(%arg0: i32) -> (i32, i32) {
    %c0_i32 = arith.constant 0 : i32
    %c0_i32_0 = arith.constant 0 : i32
    return %arg0, %c0_i32 : i32, i32
  }
}

</mosaic_0001>

<bundles_post_ra>
// kernel: tpu_custom_call.1
= control target key start
LH: loop header
LB: loop body
LE: loop exit
PB: predicated region body
PF: predicated region fallthrough
CT: control target
= control target key end

     0   :  { %12 = vsyncpa [#allocation3], 0  ;;  %s1472_s0 = inlined_call_operand.hbm [shape: f32[8,784], index: 0, kind: input, shape index: {}]   ;;  %s1473_s1 = inlined_call_operand.hbm [shape: bf16[784,128], index: 1, kind: input, shape index: {}]   ;;  %s1474_s2 = inlined_call_operand.vmem [shape: f32[1,128], index: 2, kind: input, shape index: {}]   ;;  %s1475_s3 = inlined_call_operand.hbm [shape: bf16[2,128,128], index: 3, kind: input, shape index: {}]   ;;  %s1476_s4 = inlined_call_operand.vmem [shape: f32[2,1,128], index: 4, kind: input, shape index: {}]   ;;  %s1477_s5 = inlined_call_operand.hbm [shape: bf16[128,128], index: 5, kind: input, shape index: {}]   ;;  %s1478_s6 = inlined_call_operand.vmem [shape: f32[1,128], index: 6, kind: input, shape index: {}]   ;;  %s1479_s7 = inlined_call_operand.hbm [shape: bf16[8,128], index: 7, kind: output, shape index: {}]  }
   0x1   :  { %13 = vsyncpa [#allocation6], 0 }
   0x2   :  { %14 = vsyncpa [#allocation9], 0  ;;  %s31_s26 = sshll.u32 %s1473_s1, 4  ;;  %s32_s26 = int_to_ptr.hbm [resolvable:$true] %s31_s26 }
   0x3   :  { %15 = vsyncpa [#allocation4], 0  ;;  %s1398_s27 = smov [#allocation5]   ;;  %s21_s8 = sshll.u32 %s1472_s0, 4  ;;  %s22_s8 = int_to_ptr.hbm [resolvable:$true] %s21_s8 }
   0x4   :  { %s33_s28 = sshll.u32 %s1398_s27, 4  ;;  %s1399_s9 = smov 64   ;;  %s34_s28 = int_to_ptr.vmem [resolvable:$true] %s33_s28 }
   0x5   :  { %s1400_s10 = smov 4   ;;  %s1401_s11 = smov [#allocation2]  }
   0x6   :  { %39 = dma.hbm_to_vmem [thread:$0]  %s32_s26, 6272, %s34_s28, [#allocation6], %s1399_s9, %s1399_s9, %s1400_s10  }
   0x7   :  { %s23_s12 = sshll.u32 %s1401_s11, 4  ;;  %s46_s15 = sshll.u32 %s1475_s3, 4  ;;  %s24_s12 = int_to_ptr.vmem [resolvable:$true] %s23_s12  ;;  %s47_s15 = int_to_ptr.hbm [resolvable:$true] %s46_s15 }
   0x8   :  { %26 = dma.hbm_to_vmem [thread:$0]  %s22_s8, 896, %s24_s12, [#allocation3]  }
   0x9   :  { %s61_s17 = sshll.u32 %s1477_s5, 4  ;;  %s1402_s18 = smov [#allocation7]   ;;  %s62_s17 = int_to_ptr.hbm [resolvable:$true] %s61_s17 }
   0xa   :  { %s48_s19 = sshll.u32 %s1402_s18, 4  ;;  %s1403_s0 = smov [#allocation8]   ;;  %s49_s19 = int_to_ptr.vmem [resolvable:$true] %s48_s19 }
   0xb   :  { %54 = dma.hbm_to_vmem [thread:$0]  %s47_s15, 2048, %s49_s19, [#allocation6], %s1399_s9, %s1399_s9, %s1400_s10  }
   0xc   :  { %s63_s20 = sshll.u32 %s1403_s0, 4  ;;  %s64_s20 = int_to_ptr.vmem [resolvable:$true] %s63_s20 }
   0xd   :  { %69 = dma.hbm_to_vmem [thread:$0]  %s62_s17, 1024, %s64_s20, [#allocation9], %s1399_s9, %s1399_s9, %s1400_s10  }
   0xe   :  { %1390 = dma.done.wait [#allocation3], 896  }
   0xf   :  { %1391 = vsyncadd [#allocation3], 4294966400 }
  0x10   :  { %1392 = dma.done.wait [#allocation6], 8320  }
  0x11   :  { %1393 = vsyncadd [#allocation6], 4294958976 }
  0x12   :  { %1394 = dma.done.wait [#allocation9], 1024  }
  0x13   :  { %1395 = vsyncadd [#allocation9], 4294966272  ;;  %v1189_v0 = vld [vmem:[#allocation5 + $0x38] sm:$0xff]  ;;  %v1188_v3 = vld [vmem:[#allocation5 + $0x30] sm:$0xff]  ;;  %vm499_vm0 = vcmask 130048   ;;  %s876_s28 = sshll.u32 %s1479_s7, 4  ;;  %s877_s28 = int_to_ptr.hbm [resolvable:$true] %s876_s28 }
  0x14   :  { %v1197_v1 = vld [vmem:[#allocation5 + $0x78] sm:$0xff]  ;;  %503 = vmatpush.bf16.msra.mxu0 %v1189_v0  ;;  %v1196_v4 = vld [vmem:[#allocation5 + $0x70] sm:$0xff]  ;;  %v1187_v8 = vld [vmem:[#allocation5 + $0x28] sm:$0xff] }
  0x15   :  { %v1205_v2 = vld [vmem:[#allocation5 + $0xb8] sm:$0xff]  ;;  %516 = vmatpush.bf16.msra.mxu1 %v1197_v1  ;;  %v1204_v5 = vld [vmem:[#allocation5 + $0xb0] sm:$0xff]  ;;  %v1195_v9 = vld [vmem:[#allocation5 + $0x68] sm:$0xff] }
  0x16   :  { %529 = vmatpush.bf16.msra.mxu2 %v1205_v2  ;;  %v1213_v6 = vld [vmem:[#allocation5 + $0xf8] sm:$0xff]  ;;  %v1212_v7 = vld [vmem:[#allocation5 + $0xf0] sm:$0xff]  ;;  %v1203_v10 = vld [vmem:[#allocation5 + $0xa8] sm:$0xff] }
  0x17   :  { %542 = vmatpush.bf16.msra.mxu3 %v1213_v6  ;;  %v1211_v11 = vld [vmem:[#allocation5 + $0xe8] sm:$0xff]  ;;  %v1186_v12 = vld [vmem:[#allocation5 + $0x20] sm:$0xff]  ;;  %v1185_v16 = vld [vmem:[#allocation5 + $0x18] sm:$0xff] }
  0x18   :  { %504 = vmatpush.bf16.msra.mxu0 %v1188_v3  ;;  %v1194_v13 = vld [vmem:[#allocation5 + $0x60] sm:$0xff]  ;;  %v1193_v17 = vld [vmem:[#allocation5 + $0x58] sm:$0xff]  ;;  %v1184_v20 = vld [vmem:[#allocation5 + $0x10] sm:$0xff] }
  0x19   :  { %517 = vmatpush.bf16.msra.mxu1 %v1196_v4  ;;  %v1202_v14 = vld [vmem:[#allocation5 + $0xa0] sm:$0xff]  ;;  %v1201_v18 = vld [vmem:[#allocation5 + $0x98] sm:$0xff]  ;;  %v1192_v21 = vld [vmem:[#allocation5 + $0x50] sm:$0xff] }
  0x1a   :  { %530 = vmatpush.bf16.msra.mxu2 %v1204_v5  ;;  %v1210_v15 = vld [vmem:[#allocation5 + $0xe0] sm:$0xff]  ;;  %v1209_v19 = vld [vmem:[#allocation5 + $0xd8] sm:$0xff]  ;;  %v1200_v22 = vld [vmem:[#allocation5 + $0x90] sm:$0xff] }
  0x1b   :  { %543 = vmatpush.bf16.msra.mxu3 %v1212_v7  ;;  %v1208_v23 = vld [vmem:[#allocation5 + $0xd0] sm:$0xff]  ;;  %v1183_v24 = vld [vmem:[#allocation5 + $0x8] sm:$0xff]  ;;  %v1182_v27 = vld [vmem:[#allocation5] sm:$0xff] }
  0x1c   :  { %505 = vmatpush.bf16.msra.mxu0 %v1187_v8  ;;  %v1191_v25 = vld [vmem:[#allocation5 + $0x48] sm:$0xff]  ;;  %v1190_v29 = vld [vmem:[#allocation5 + $0x40] sm:$0xff]  ;;  %v90_v31 = vld [vmem:[#allocation2 + $0x8] sm:$0xff] }
  0x1d   :  { %518 = vmatpush.bf16.msra.mxu1 %v1195_v9  ;;  %v1199_v26 = vld [vmem:[#allocation5 + $0x88] sm:$0xff]  ;;  %v1221_v32 = vld [vmem:[#allocation5 + $0x138] sm:$0xff]  ;;  %v1198_v34 = vld [vmem:[#allocation5 + $0x80] sm:$0xff]  ;;  %v97_v37 = vpack.c.bf16 %v90_v31, %v90_v31 }
  0x1e   :  { %531 = vmatpush.bf16.msra.mxu2 %v1203_v10  ;;  %v1207_v28 = vld [vmem:[#allocation5 + $0xc8] sm:$0xff]  ;;  %v1229_v33 = vld [vmem:[#allocation5 + $0x178] sm:$0xff]  ;;  %v1206_v38 = vld [vmem:[#allocation5 + $0xc0] sm:$0xff] }
  0x1f   :  { %544 = vmatpush.bf16.msra.mxu3 %v1211_v11  ;;  %v89_v30 = vld [vmem:[#allocation2] sm:$0xff]  ;;  %v91_v35 = vld [vmem:[#allocation2 + $0x10] sm:$0xff]  ;;  %v1230_v39 = vld [vmem:[#allocation5 + $0x180] sm:$0xff] }
  0x20   :  { %506 = vmatpush.bf16.msra.mxu0 %v1186_v12  ;;  %v96_v36 = vpack.c.bf16 %v89_v30, %v89_v30  ;;  %v92_v40 = vld [vmem:[#allocation2 + $0x18] sm:$0xff]  ;;  %v1220_v41 = vld [vmem:[#allocation5 + $0x130] sm:$0xff]  ;;  %v98_v43 = vpack.c.bf16 %v91_v35, %v91_v35  ;;  %v1219_v45 = vld [vmem:[#allocation5 + $0x128] sm:$0xff] }
  0x21   :  { %519 = vmatpush.bf16.msra.mxu1 %v1194_v13  ;;  %v1228_v42 = vld [vmem:[#allocation5 + $0x170] sm:$0xff]  ;;  %v99_v44 = vpack.c.bf16 %v92_v40, %v92_v40  ;;  %v1227_v46 = vld [vmem:[#allocation5 + $0x168] sm:$0xff]  ;;  %v1218_v47 = vld [vmem:[#allocation5 + $0x120] sm:$0xff] }
  0x22   :  { %532 = vmatpush.bf16.msra.mxu2 %v1202_v14  ;;  %v1226_v48 = vld [vmem:[#allocation5 + $0x160] sm:$0xff]  ;;  %v1217_v49 = vld [vmem:[#allocation5 + $0x118] sm:$0xff]  ;;  %v1216_v52 = vld [vmem:[#allocation5 + $0x110] sm:$0xff] }
  0x23   :  { %545 = vmatpush.bf16.msra.mxu3 %v1210_v15  ;;  %v1225_v50 = vld [vmem:[#allocation5 + $0x158] sm:$0xff]  ;;  %v1224_v53 = vld [vmem:[#allocation5 + $0x150] sm:$0xff]  ;;  %v1215_v55 = vld [vmem:[#allocation5 + $0x108] sm:$0xff] }
  0x24   :  { %507 = vmatpush.bf16.msra.mxu0 %v1185_v16  ;;  %v95_v51 = vld [vmem:[#allocation2 + $0x30] sm:$0xff]  ;;  %v1223_v56 = vld [vmem:[#allocation5 + $0x148] sm:$0xff]  ;;  %v1214_v57 = vld [vmem:[#allocation5 + $0x100] sm:$0xff] }
  0x25   :  { %520 = vmatpush.bf16.msra.mxu1 %v1193_v17  ;;  %v102_v54 = vpack.c.bf16 %v95_v51, %v95_v51  ;;  %v1222_v58 = vld [vmem:[#allocation5 + $0x140] sm:$0xff]  ;;  %v93_v59 = vld [vmem:[#allocation2 + $0x20] sm:$0xff]  ;;  %v94_v60 = vld [vmem:[#allocation2 + $0x28] sm:$0xff] }
  0x26   :  { %533 = vmatpush.bf16.msra.mxu2 %v1201_v18  ;;  %v100_v61 = vpack.c.bf16 %v93_v59, %v93_v59  ;;  %v101_v62 = vpack.c.bf16 %v94_v60, %v94_v60  ;;  %v1238_v63 = vld [vmem:[#allocation7 + $0x38] sm:$0xff]  ;;  %v1237_v0 = vld [vmem:[#allocation7 + $0x30] sm:$0xff]  ;;  %v1236_v1 = vld [vmem:[#allocation7 + $0x28] sm:$0xff] }
  0x27   :  { %546 = vmatpush.bf16.msra.mxu3 %v1209_v19  ;;  %v1235_v2 = vld [vmem:[#allocation7 + $0x20] sm:$0xff]  ;;  %v1234_v3 = vld [vmem:[#allocation7 + $0x18] sm:$0xff]  ;;  %v1233_v4 = vld [vmem:[#allocation7 + $0x10] sm:$0xff] }
  0x28   :  { %508 = vmatpush.bf16.msra.mxu0 %v1184_v20  ;;  %v1232_v5 = vld [vmem:[#allocation7 + $0x8] sm:$0xff]  ;;  %v1231_v8 = vld [vmem:[#allocation7] sm:$0xff]  ;;  %v1246_v11 = vld [vmem:[#allocation7 + $0x78] sm:$0xff] }
  0x29   :  { %521 = vmatpush.bf16.msra.mxu1 %v1192_v21  ;;  %v1245_v14 = vld [vmem:[#allocation7 + $0x70] sm:$0xff]  ;;  %v1262_v15 = vld [vmem:[%s1474_s2] ss:$0 sm:$0xff]  ;;  %v1244_v16 = vld [vmem:[#allocation7 + $0x68] sm:$0xff] }
  0x2a   :  { %534 = vmatpush.bf16.msra.mxu2 %v1200_v22  ;;  %v1243_v20 = vld [vmem:[#allocation7 + $0x60] sm:$0xff]  ;;  %v1242_v22 = vld [vmem:[#allocation7 + $0x58] sm:$0xff]  ;;  %v1253_v40 = vld [vmem:[#allocation8 + $0x30] sm:$0xff] }
  0x2b   :  { %547 = vmatpush.bf16.msra.mxu3 %v1208_v23  ;;  %v1248_v51 = vld [vmem:[#allocation8 + $0x8] sm:$0xff]  ;;  %v1265_v59 = vld [vmem:[%s1478_s6] ss:$0 sm:$0xff] }
  0x2c   :  { %509 = vmatpush.bf16.msra.mxu0 %v1183_v24 }
  0x2d   :  { %522 = vmatpush.bf16.msra.mxu1 %v1191_v25  ;;  %v1241_v25 = vld [vmem:[#allocation7 + $0x50] sm:$0xff] }
  0x2e   :  { %535 = vmatpush.bf16.msra.mxu2 %v1199_v26 }
  0x2f   :  { %548 = vmatpush.bf16.msra.mxu3 %v1207_v28 }
  0x30   :  { %510 = vmatpush.bf16.msra.mxu0 %v1182_v27 }
  0x31   :  { %523 = vmatpush.bf16.msra.mxu1 %v1190_v29 }
  0x32   :  { %536 = vmatpush.bf16.msra.mxu2 %v1198_v34 }
  0x33   :  { %511 = vmatmul.bf16.vlgmr.msra.gmra.mxu0 %v96_v36  ;;  %549 = vmatpush.bf16.msra.mxu3 %v1206_v38  ;;  %v1239_v38 = vld [vmem:[#allocation7 + $0x40] sm:$0xff] }
  0x34   :  { %555 = vmatpush.bf16.msrb.mxu0 %v1221_v32  ;;  %524 = vmatmul.bf16.vlgmr.msra.gmra.mxu1 %v97_v37  ;;  %v1240_v37 = vld [vmem:[#allocation7 + $0x48] sm:$0xff] }
  0x35   :  { %568 = vmatpush.bf16.msrb.mxu1 %v1229_v33  ;;  %537 = vmatmul.bf16.vlgmr.msra.gmra.mxu2 %v98_v43  ;;  %v1250_v43 = vld [vmem:[#allocation8 + $0x18] sm:$0xff] }
  0x36   :  { %588 = vmatpush.bf16.msrb.mxu2 %v1230_v39  ;;  %550 = vmatmul.bf16.vlgmr.msra.gmra.mxu3 %v99_v44  ;;  %v1254_v39 = vld [vmem:[#allocation8 + $0x38] sm:$0xff]  ;;  %v1249_v44 = vld [vmem:[#allocation8 + $0x10] sm:$0xff] }
  0x37   :  { %664 = vmatpush.bf16.msrb.mxu3 %v1238_v63 }
  0x38   :  { %556 = vmatpush.bf16.msrb.mxu0 %v1220_v41  ;;  %v1252_v41 = vld [vmem:[#allocation8 + $0x28] sm:$0xff] }
  0x39   :  { %569 = vmatpush.bf16.msrb.mxu1 %v1228_v42  ;;  %v1251_v42 = vld [vmem:[#allocation8 + $0x20] sm:$0xff] }
  0x3a   :  { %749 = vmatpush.bf16.msra.mxu2 %v1246_v11 }
  0x3b   :  { %665 = vmatpush.bf16.msrb.mxu3 %v1237_v0 }
  0x3c   :  { %557 = vmatpush.bf16.msrb.mxu0 %v1219_v45  ;;  %v1263_v45 = vld [vmem:[%s1476_s4] ss:$0 sm:$0xff] }
  0x3d   :  { %570 = vmatpush.bf16.msrb.mxu1 %v1227_v46 }
  0x3e   :  { %750 = vmatpush.bf16.msra.mxu2 %v1245_v14 }
  0x3f   :  { %666 = vmatpush.bf16.msrb.mxu3 %v1236_v1 }
  0x40   :  { %558 = vmatpush.bf16.msrb.mxu0 %v1218_v47 }
  0x41   :  { %571 = vmatpush.bf16.msrb.mxu1 %v1226_v48 }
  0x42   :  { %751 = vmatpush.bf16.msra.mxu2 %v1244_v16 }
  0x43   :  { %667 = vmatpush.bf16.msrb.mxu3 %v1235_v2 }
  0x44   :  { %559 = vmatpush.bf16.msrb.mxu0 %v1217_v49 }
  0x45   :  { %572 = vmatpush.bf16.msrb.mxu1 %v1225_v50  ;;  %1084 = vmatmul.msk.bf16.vlgmr.msrb.gmra.mxu2 %vm499_vm0, %v102_v54 }
  0x46   :  { %752 = vmatpush.bf16.msra.mxu2 %v1243_v20 }
  0x47   :  { %668 = vmatpush.bf16.msrb.mxu3 %v1234_v3 }
  0x48   :  { %560 = vmatpush.bf16.msrb.mxu0 %v1216_v52  ;;  %v1247_v52 = vld [vmem:[#allocation8] sm:$0xff] }
  0x49   :  { %573 = vmatpush.bf16.msrb.mxu1 %v1224_v53  ;;  %v1264_v53 = vld [vmem:[%s1476_s4 + $0x1] ss:$0 sm:$0xff]  ;;  %s1404_s4 = smov [#allocation10]  }
  0x4a   :  { %753 = vmatpush.bf16.msra.mxu2 %v1242_v22  ;;  %s874_s6 = sshll.u32 %s1404_s4, 4  ;;  %s875_s6 = int_to_ptr.vmem [resolvable:$true] %s874_s6 }
  0x4b   :  { %669 = vmatpush.bf16.msrb.mxu3 %v1233_v4 }
  0x4c   :  { %561 = vmatpush.bf16.msrb.mxu0 %v1215_v55 }
  0x4d   :  { %574 = vmatpush.bf16.msrb.mxu1 %v1223_v56 }
  0x4e   :  { %754 = vmatpush.bf16.msra.mxu2 %v1241_v25 }
  0x4f   :  { %670 = vmatpush.bf16.msrb.mxu3 %v1232_v5 }
  0x50   :  { %562 = vmatpush.bf16.msrb.mxu0 %v1214_v57 }
  0x51   :  { %575 = vmatpush.bf16.msrb.mxu1 %v1222_v58 }
  0x52   :  { %755 = vmatpush.bf16.msra.mxu2 %v1240_v37 }
  0x53   :  { %563 = vmatmul.bf16.vlgmr.msrb.gmra.mxu0 %v100_v61  ;;  %671 = vmatpush.bf16.msrb.mxu3 %v1231_v8 }
  0x54   :  { %576 = vmatmul.bf16.vlgmr.msrb.gmra.mxu1 %v101_v62  ;;  %832 = vmatpush.bf16.msra.mxu0 %v1254_v39 }
  0x56   :  { %756 = vmatpush.bf16.msra.mxu2 %v1239_v38 }
  0x58   :  { %833 = vmatpush.bf16.msra.mxu0 %v1253_v40 }
  0x5c   :  { %834 = vmatpush.bf16.msra.mxu0 %v1252_v41 }
  0x60   :  { %835 = vmatpush.bf16.msra.mxu0 %v1251_v42 }
  0x64   :  { %836 = vmatpush.bf16.msra.mxu0 %v1250_v43 }
  0x68   :  { %837 = vmatpush.bf16.msra.mxu0 %v1249_v44 }
  0x6c   :  { %838 = vmatpush.bf16.msra.mxu0 %v1248_v51 }
  0x70   :  { %839 = vmatpush.bf16.msra.mxu0 %v1247_v52 }
  0xb0   :  { %v512_v6 = vpop.f32.mrf.mxu0 }
  0xb1   :  { %v525_v7 = vpop.f32.mrf.mxu1  ;;  %v513_v17 = vadd.f32 %v1262_v15, %v512_v6 }
  0xb3   :  { %v526_v21 = vadd.f32 %v525_v7, %v513_v17 }
  0xb8   :  { %v514_v9 = vpop.f32.mrf.mxu0  ;;  %v538_v12 = vpop.f32.mrf.mxu2 }
  0xb9   :  { %v527_v10 = vpop.f32.mrf.mxu1  ;;  %v551_v13 = vpop.f32.mrf.mxu3  ;;  %v539_v23 = vadd.f32 %v538_v12, %v526_v21 }
  0xbb   :  { %v552_v26 = vadd.f32 %v551_v13, %v539_v23 }
  0xc0   :  { %v540_v18 = vpop.f32.mrf.mxu2 }
  0xc1   :  { %v553_v19 = vpop.f32.mrf.mxu3 }
  0xc8   :  { %v590_v24 = vpop.f32.mrf.mxu2 }
  0xd0   :  { %v564_v27 = vpop.f32.mrf.mxu0  ;;  %v592_v31 = vpop.f32.mrf.mxu2 }
  0xd1   :  { %v577_v28 = vpop.f32.mrf.mxu1  ;;  %v565_v29 = vadd.f32 %v564_v27, %v552_v26 }
  0xd3   :  { %v578_v30 = vadd.f32 %v577_v28, %v565_v29 }
  0xd5   :  { %v591_v32 = vadd.f32 %v590_v24, %v578_v30 }
  0xd7   :  { %v594_v33 = vmax.f32 %v591_v32, 0.0 }
  0xd8   :  { %v566_v34 = vpop.f32.mrf.mxu0 }
  0xd9   :  { %v579_v35 = vpop.f32.mrf.mxu1  ;;  %v595_v36 = vpack.c.bf16 %v594_v33, %v594_v33 }
  0xdb   :  { %672 = vmatmul.bf16.vlgmr.msrb.gmra.mxu3 %v595_v36 }
 0x15e   :  { %v673_v46 = vpop.f32.mrf.mxu3 }
 0x15f   :  { %v674_v47 = vadd.f32 %v1263_v45, %v673_v46 }
 0x161   :  { %v677_v48 = vmax.f32 %v674_v47, 0.0 }
 0x163   :  { %v678_v49 = vpack.c.bf16 %v677_v48, %v677_v48 }
 0x165   :  { %757 = vmatmul.bf16.vlgmr.msra.gmra.mxu2 %v678_v49 }
 0x166   :  { %v675_v50 = vpop.f32.mrf.mxu3 }
 0x1e8   :  { %v758_v54 = vpop.f32.mrf.mxu2 }
 0x1e9   :  { %v759_v55 = vadd.f32 %v1264_v53, %v758_v54 }
 0x1eb   :  { %v762_v56 = vmax.f32 %v759_v55, 0.0 }
 0x1ed   :  { %v763_v57 = vpack.c.bf16 %v762_v56, %v762_v56 }
 0x1ef   :  { %840 = vmatmul.bf16.vlgmr.msra.gmra.mxu0 %v763_v57 }
 0x1f0   :  { %v760_v58 = vpop.f32.mrf.mxu2 }
 0x26c   :  { %v841_v60 = vpop.f32.mrf.mxu0 }
 0x26d   :  { %v842_v61 = vadd.f32 %v1265_v59, %v841_v60 }
 0x26f   :  { %845 = vmax.xlane.f32.xlu0 %v842_v61 }
 0x274   :  { %v843_v62 = vpop.f32.mrf.mxu0 }
 0x2e2   :  { %v846_v63 = vpop.xlane.xlu0 %845 }
 0x2e3   :  { %v847_v0 = vsub.f32 %v842_v61, %v846_v63 }
 0x2e5   :  { %v848_v1 = vmul.f32 1.442695, %v847_v0 }
 0x2e7   :  { %1266 = vpow2.f32 %v848_v1 }
 0x2ed   :  { %v1267_v2 = vpop.eup %1266 }
 0x2ee   :  { %850 = vadd.xlane.f32.xlu0 %v1267_v2 }
 0x361   :  { %v851_v3 = vpop.xlane.xlu0 %850 }
 0x362   :  { %1268 = vrcp.f32 %v851_v3  ;;  %v863_v7 = vand.u32 2147483648, %v851_v3  ;;  %v861_v9 = vand.u32 2147483647, %v851_v3  ;;  %vm857_vm2 = vweird.f32 %v851_v3 }
 0x364   :  { %v864_v11 = vor.u32 1.1754944e-38, %v863_v7  ;;  %vm862_vm4 = vcmp.eq.f32.partialorder %v861_v9, 8.507059e+37 }
 0x368   :  { %v1269_v4 = vpop.eup %1268 }
 0x369   :  { %v853_v5 = vmul.f32 %v1269_v4, %v851_v3  ;;  %vm858_vm1 = vweird.f32 %v1269_v4 }
 0x36a   :  { %vm859_vm3 = vmor %vm857_vm2, %vm858_vm1 }
 0x36b   :  { %v854_v6 = vsub.f32 1.0, %v853_v5 }
 0x36d   :  { %v855_v8 = vmul.f32 %v1269_v4, %v854_v6 }
 0x36f   :  { %v856_v10 = vadd.f32 %v1269_v4, %v855_v8 }
 0x371   :  { %v860_v12 = vsel %vm859_vm3, %v1269_v4, %v856_v10 }
 0x372   :  { %v865_v13 = vsel %vm862_vm4, %v864_v11, %v860_v12 }
 0x373   :  { %v866_v14 = vmul.f32 %v1267_v2, %v865_v13 }
 0x375   :  { %v867_v15 = vpack.c.bf16 %v866_v14, %v866_v14 }
 0x377   :  { %868 = vst [vmem:[#allocation10] sm:$0xf] %v867_v15 }
 0x378   :  { %879 = dma.vmem_to_hbm [thread:$0]  %s875_s6, 64, %s877_s28, [#allocation4]  }
 0x379   :  { %1396 = dma.done.wait [#allocation4], 64  }
 0x37a   :  { %1397 = vsyncadd [#allocation4], 4294967232 }
 0x37b   :  { %884 = vsyncpa [#allocation3], 1 }
 0x37c   :  { %885 = vsyncpa [#allocation6], 1 }
 0x37d   :  { %886 = vsyncpa [#allocation9], 1 }
 0x37e   :  { %887 = vsyncpa [#allocation4], 1 }

</bundles_post_ra>
